<compile_context>
chip_gen: v5e
topology: v5e:2x2
jax: 0.10.0
libtpu: 0.0.40
codegen_flags: <defaults>
</compile_context>

<pallas_src>
import functools

import jax
import jax.numpy as jnp
from jax.experimental import pallas as pl
from jax.experimental.pallas import tpu as pltpu

_EPS = 1e-8
_THRESH = 2e-4
# ~2 MiB per input block: large enough to amortize per-grid-step overhead
# (measured copy-style kernels reach ~85% of HBM roofline at this size), small
# enough that double-buffering (2x) stays far below every generation's scoped
# VMEM default (16 MiB v5e, 32 MiB v6e/v7x).
_MAX_BLOCK_BYTES = 2 * 1024 * 1024


def _stats_kernel(x_ref, sum_ref, cnt_ref, *, eps, thresh):
    """Accumulate sum(std[std>=thresh]) and count over one (N, tf) column tile."""

    @pl.when(pl.program_id(0) == 0)
    def _init():
        sum_ref[...] = jnp.zeros_like(sum_ref)
        cnt_ref[...] = jnp.zeros_like(cnt_ref)

    x = x_ref[...].astype(jnp.float32)                        # (N, tf)
    inv_n = 1.0 / x.shape[0]
    mean = jnp.sum(x, axis=0, keepdims=True) * inv_n          # (1, tf)
    mean_sq = jnp.sum(x * x, axis=0, keepdims=True) * inv_n   # (1, tf)
    var = mean_sq - mean * mean
    var = jnp.where(var < eps, eps, var)
    std = jnp.sqrt(var)
    keep = std >= thresh
    sum_ref[...] += jnp.sum(jnp.where(keep, std, 0.0), keepdims=True)
    cnt_ref[...] += jnp.sum(keep.astype(jnp.float32), keepdims=True)


def _concat_kernel(std_ref, x_ref, o_ref, *, num_in_ch):
    """One sample: channels [0, D) copy x, channel D is the std scalar."""
    d = num_in_ch
    hw = o_ref.shape[-1]
    o_ref[:, 0:d, :] = x_ref[...].astype(o_ref.dtype)
    fill = std_ref[0, 0].astype(o_ref.dtype)
    o_ref[:, d:d + 1, :] = jnp.full((1, 1, hw), fill, dtype=o_ref.dtype)


def batch_std(x, *, eps=_EPS, thresh=_THRESH):
    """Pallas TPU implementation of the PyTorch BatchStd module's forward."""
    n, d, h, w = x.shape
    hw = h * w
    f = d * hw
    itemsize = jnp.dtype(x.dtype).itemsize

    # ---- Kernel 1: masked std statistics over the batch axis ---------------
    x2 = jnp.reshape(x, (n, f))
    tf_cap = max(128, (_MAX_BLOCK_BYTES // (n * itemsize)) // 128 * 128)
    tf = min(pl.cdiv(f, 128) * 128, tf_cap)
    f_pad = pl.cdiv(f, tf) * tf
    if f_pad != f:
        # Zero columns give var=0 -> eps -> std=1e-4 < thresh: auto-excluded.
        x2 = jnp.pad(x2, ((0, 0), (0, f_pad - f)))

    masked_sum, masked_cnt = pl.pallas_call(
        functools.partial(_stats_kernel, eps=eps, thresh=thresh),
        out_shape=(
            jax.ShapeDtypeStruct((1, 1), jnp.float32),
            jax.ShapeDtypeStruct((1, 1), jnp.float32),
        ),
        grid_spec=pltpu.PrefetchScalarGridSpec(
            num_scalar_prefetch=0,
            grid=(f_pad // tf,),
            in_specs=[pl.BlockSpec((n, tf), lambda j: (0, j))],
            out_specs=[
                pl.BlockSpec((1, 1), lambda j: (0, 0)),
                pl.BlockSpec((1, 1), lambda j: (0, 0)),
            ],
        ),
        compiler_params=pltpu.CompilerParams(
            dimension_semantics=("arbitrary",)  # reduction axis (accumulator)
        ),
    )(x2)

    # Scalar divide (NaN when no std passes the threshold, matching torch's
    # mean over an empty selection).
    std_scalar = (masked_sum / masked_cnt).astype(jnp.float32)  # (1, 1)

    # ---- Kernel 2: concat x with the broadcast std channel -----------------
    x3 = jnp.reshape(x, (n, d, hw))
    out3 = pl.pallas_call(
        functools.partial(_concat_kernel, num_in_ch=d),
        out_shape=jax.ShapeDtypeStruct((n, d + 1, hw), x.dtype),
        grid_spec=pltpu.PrefetchScalarGridSpec(
            num_scalar_prefetch=0,
            grid=(n,),
            in_specs=[
                pl.BlockSpec((1, 1), lambda i: (0, 0)),
                pl.BlockSpec((1, d, hw), lambda i: (i, 0, 0)),
            ],
            out_specs=pl.BlockSpec((1, d + 1, hw), lambda i: (i, 0, 0)),
        ),
        compiler_params=pltpu.CompilerParams(
            dimension_semantics=("parallel",)  # samples independent (megacore)
        ),
    )(std_scalar, x3)

    # Metadata-only reshape back to NCHW.
    return jnp.reshape(out3, (n, d + 1, h, w))


if __name__ == "__main__":
    key = jax.random.PRNGKey(0)
    N, C, H, W = 2, 4, 16, 16
    x = jax.random.normal(key, (N, C, H, W), dtype=jnp.float32)

    y = jax.block_until_ready(batch_std(x))

    # Pure-JAX reference (mirrors the PyTorch BatchStd forward).
    var = jnp.mean(x ** 2, axis=0) - jnp.mean(x, axis=0) ** 2
    var = jnp.where(var < _EPS, _EPS, var)
    std = jnp.sqrt(var)
    keep = std >= _THRESH
    std_mean = jnp.sum(jnp.where(keep, std, 0.0)) / jnp.sum(keep)
    ref = jnp.concatenate(
        [x, jnp.full((N, 1, H, W), std_mean, dtype=x.dtype)], axis=1
    )

    assert y.shape == (N, C + 1, H, W)
    assert jnp.array_equal(y[:, :C], x)                         # pass-through channels
    assert jnp.allclose(y[:, C:], ref[:, C:], rtol=1e-5, atol=1e-6)
    print("KERNEL_OK")
</pallas_src>

<mosaic_0001>
module attributes {stable_mosaic.version = 11 : i64} {
  func.func @_stats_kernel(%arg0: i32, %arg1: memref<2x1024xf32, #tpu.memory_space<vmem>>, %arg2: memref<1x1xf32, #tpu.memory_space<vmem>>, %arg3: memref<1x1xf32, #tpu.memory_space<vmem>>) attributes {dimension_semantics = [#tpu.dimension_semantics<arbitrary>], iteration_bounds = array<i64: 1>, scalar_prefetch = 0 : i64, scratch_operands = 0 : i64, tpu.core_type = #tpu.core_type<tc>, window_params = [{transform_indices = @transform_0, window_bounds = array<i64: 2, 1024>}, {pipeline_mode = #tpu.pipeline_mode<synchronous>, transform_indices = @transform_1, window_bounds = array<i64: 1, 1>}, {pipeline_mode = #tpu.pipeline_mode<synchronous>, transform_indices = @transform_2, window_bounds = array<i64: 1, 1>}]} {
    %c0_i32 = arith.constant 0 : i32
    %0 = arith.cmpi eq, %arg0, %c0_i32 : i32
    %1 = arith.extui %0 : i1 to i32
    %c0_i32_0 = arith.constant 0 : i32
    %2 = arith.cmpi ne, %1, %c0_i32_0 : i32
    scf.if %2 {
      %cst_19 = arith.constant 0.000000e+00 : f32
      %42 = vector.broadcast %cst_19 : f32 to vector<1x1xf32>
      %c0_20 = arith.constant 0 : index
      %c0_21 = arith.constant 0 : index
      %43 = vector.load %arg2[%c0_20, %c0_21] : memref<1x1xf32, #tpu.memory_space<vmem>>, vector<1x1xf32>
      tpu.vector_store %arg2[%c0_20, %c0_21], %42 {strides = array<i32>} : memref<1x1xf32, #tpu.memory_space<vmem>>, vector<1x1xf32>,
      %cst_22 = arith.constant 0.000000e+00 : f32
      %44 = vector.broadcast %cst_22 : f32 to vector<1x1xf32>
      %c0_23 = arith.constant 0 : index
      %c0_24 = arith.constant 0 : index
      %45 = vector.load %arg3[%c0_23, %c0_24] : memref<1x1xf32, #tpu.memory_space<vmem>>, vector<1x1xf32>
      tpu.vector_store %arg3[%c0_23, %c0_24], %44 {strides = array<i32>} : memref<1x1xf32, #tpu.memory_space<vmem>>, vector<1x1xf32>,
    } else {
    }
    %c0 = arith.constant 0 : index
    %c0_1 = arith.constant 0 : index
    %3 = vector.load %arg1[%c0, %c0_1] : memref<2x1024xf32, #tpu.memory_space<vmem>>, vector<2x1024xf32>
    %cst = arith.constant dense<0.000000e+00> : vector<1024xf32>
    %4 = vector.multi_reduction <add>, %3, %cst [0] : vector<2x1024xf32> to vector<1024xf32>
    %5 = vector.shape_cast %4 : vector<1024xf32> to vector<1x1024xf32>
    %cst_2 = arith.constant 5.000000e-01 : f32
    %6 = vector.broadcast %cst_2 : f32 to vector<1x1024xf32>
    %7 = arith.mulf %5, %6 : vector<1x1024xf32>
    %8 = arith.mulf %3, %3 : vector<2x1024xf32>
    %cst_3 = arith.constant dense<0.000000e+00> : vector<1024xf32>
    %9 = vector.multi_reduction <add>, %8, %cst_3 [0] : vector<2x1024xf32> to vector<1024xf32>
    %10 = vector.shape_cast %9 : vector<1024xf32> to vector<1x1024xf32>
    %cst_4 = arith.constant 5.000000e-01 : f32
    %11 = vector.broadcast %cst_4 : f32 to vector<1x1024xf32>
    %12 = arith.mulf %10, %11 : vector<1x1024xf32>
    %13 = arith.mulf %7, %7 : vector<1x1024xf32>
    %14 = arith.subf %12, %13 : vector<1x1024xf32>
    %cst_5 = arith.constant 9.99999993E-9 : f32
    %15 = vector.broadcast %cst_5 : f32 to vector<1x1024xf32>
    %16 = arith.cmpf olt, %14, %15 : vector<1x1024xf32>
    %cst_6 = arith.constant 9.99999993E-9 : f32
    %17 = vector.broadcast %cst_6 : f32 to vector<1x1024xf32>
    %18 = arith.select %16, %17, %14 : vector<1x1024xi1>, vector<1x1024xf32>
    %19 = math.sqrt %18 : vector<1x1024xf32>
    %cst_7 = arith.constant 2.000000e-04 : f32
    %20 = vector.broadcast %cst_7 : f32 to vector<1x1024xf32>
    %21 = arith.cmpf oge, %19, %20 : vector<1x1024xf32>
    %c0_8 = arith.constant 0 : index
    %c0_9 = arith.constant 0 : index
    %22 = vector.load %arg2[%c0_8, %c0_9] : memref<1x1xf32, #tpu.memory_space<vmem>>, vector<1x1xf32>
    %cst_10 = arith.constant 0.000000e+00 : f32
    %23 = vector.broadcast %cst_10 : f32 to vector<1x1024xf32>
    %24 = arith.select %21, %19, %23 : vector<1x1024xi1>, vector<1x1024xf32>
    %25 = vector.shape_cast %24 : vector<1x1024xf32> to vector<1x1x1024xf32>
    %cst_11 = arith.constant dense<0.000000e+00> : vector<1xf32>
    %26 = vector.multi_reduction <add>, %25, %cst_11 [1, 2] : vector<1x1x1024xf32> to vector<1xf32>
    %27 = vector.shape_cast %26 : vector<1xf32> to vector<1x1x1xf32>
    %28 = vector.extract %27[0, 0, 0] : f32 from vector<1x1x1xf32>
    %29 = vector.broadcast %28 : f32 to vector<1x1xf32>
    %30 = arith.addf %22, %29 : vector<1x1xf32>
    %c0_12 = arith.constant 0 : index
    %c0_13 = arith.constant 0 : index
    %31 = vector.load %arg2[%c0_12, %c0_13] : memref<1x1xf32, #tpu.memory_space<vmem>>, vector<1x1xf32>
    tpu.vector_store %arg2[%c0_12, %c0_13], %30 {strides = array<i32>} : memref<1x1xf32, #tpu.memory_space<vmem>>, vector<1x1xf32>,
    %c0_14 = arith.constant 0 : index
    %c0_15 = arith.constant 0 : index
    %32 = vector.load %arg3[%c0_14, %c0_15] : memref<1x1xf32, #tpu.memory_space<vmem>>, vector<1x1xf32>
    %33 = arith.extui %21 : vector<1x1024xi1> to vector<1x1024xi32>
    %34 = arith.sitofp %33 : vector<1x1024xi32> to vector<1x1024xf32>
    %35 = vector.shape_cast %34 : vector<1x1024xf32> to vector<1x1x1024xf32>
    %cst_16 = arith.constant dense<0.000000e+00> : vector<1xf32>
    %36 = vector.multi_reduction <add>, %35, %cst_16 [1, 2] : vector<1x1x1024xf32> to vector<1xf32>
    %37 = vector.shape_cast %36 : vector<1xf32> to vector<1x1x1xf32>
    %38 = vector.extract %37[0, 0, 0] : f32 from vector<1x1x1xf32>
    %39 = vector.broadcast %38 : f32 to vector<1x1xf32>
    %40 = arith.addf %32, %39 : vector<1x1xf32>
    %c0_17 = arith.constant 0 : index
    %c0_18 = arith.constant 0 : index
    %41 = vector.load %arg3[%c0_17, %c0_18] : memref<1x1xf32, #tpu.memory_space<vmem>>, vector<1x1xf32>
    tpu.vector_store %arg3[%c0_17, %c0_18], %40 {strides = array<i32>} : memref<1x1xf32, #tpu.memory_space<vmem>>, vector<1x1xf32>,
    return
  }
  func.func @transform_0(%arg0: i32) -> (i32, i32) {
    %c0_i32 = arith.constant 0 : i32
    %c0_i32_0 = arith.constant 0 : i32
    return %c0_i32, %arg0 : i32, i32
  }
  func.func @transform_1(%arg0: i32) -> (i32, i32) {
    %c0_i32 = arith.constant 0 : i32
    %c0_i32_0 = arith.constant 0 : i32
    %c0_i32_1 = arith.constant 0 : i32
    return %c0_i32, %c0_i32_0 : i32, i32
  }
  func.func @transform_2(%arg0: i32) -> (i32, i32) {
    %c0_i32 = arith.constant 0 : i32
    %c0_i32_0 = arith.constant 0 : i32
    %c0_i32_1 = arith.constant 0 : i32
    return %c0_i32, %c0_i32_0 : i32, i32
  }
}

</mosaic_0001>

<bundles_post_ra>
// kernel: tpu_custom_call.1
= control target key start
LH: loop header
LB: loop body
LE: loop exit
PB: predicated region body
PF: predicated region fallthrough
CT: control target
= control target key end

     0   :  { %8 = vsyncpa [#allocation3], 0  ;;  %s787_s0 = inlined_call_operand.hbm [shape: f32[2,1024], index: 0, kind: input, shape index: {}]   ;;  %s788_s1 = inlined_call_operand.hbm [shape: f32[1,1], index: 1, kind: output, shape index: {0}]   ;;  %s789_s2 = inlined_call_operand.hbm [shape: f32[1,1], index: 2, kind: output, shape index: {1}]  }
   0x1   :  { %9 = vsyncpa [#allocation4], 0 }
   0x2   :  { %10 = vsyncpa [#allocation7], 0  ;;  %s16_s11 = sshll.u32 %s787_s0, 4  ;;  %s569_s12 = smov [#allocation2]   ;;  %s17_s11 = int_to_ptr.hbm [resolvable:$true] %s16_s11 }
   0x3   :  { %s18_s13 = sshll.u32 %s569_s12, 4  ;;  %s19_s13 = int_to_ptr.vmem [resolvable:$true] %s18_s13 }
   0x4   :  { %21 = dma.hbm_to_vmem [thread:$0]  %s17_s11, 256, %s19_s13, [#allocation3]  }
   0x5   :  { %563 = dma.done.wait [#allocation3], 256  }
   0x6   :  { %564 = vsyncadd [#allocation3], 4294967040  ;;  %v33_v0 = vld [vmem:[#allocation2] sm:$0xff]  ;;  %v34_v1 = vld [vmem:[#allocation2 + $0x8] sm:$0xff]  ;;  %vm56_vm0 = vcmask 1041408   ;;  %s571_s0 = smov [#allocation5]  }
   0x7   :  { %37 = vst [vmem:[#allocation1] ss:$4 sm:$0xff] %v33_v0  ;;  %v121_v4 = vmul.f32 %v33_v0, %v33_v0  ;;  %v122_v7 = vmul.f32 %v34_v1, %v34_v1  ;;  %s431_s14 = sshll.u32 %s571_s0, 4  ;;  %s433_s17 = sshll.u32 %s788_s1, 4  ;;  %s432_s14 = int_to_ptr.vmem [resolvable:$true] %s431_s14  ;;  %s434_s17 = int_to_ptr.hbm [resolvable:$true] %s433_s17 }
   0x8   :  { %39 = vst [vmem:[#allocation1 + $0x20] ss:$4 sm:$0xff] %v34_v1  ;;  %s572_s19 = smov [#allocation6]   ;;  %s444_s23 = sshll.u32 %s789_s2, 4  ;;  %s445_s23 = int_to_ptr.hbm [resolvable:$true] %s444_s23 }
   0x9   :  { %s442_s20 = sshll.u32 %s572_s19, 4  ;;  %s443_s20 = int_to_ptr.vmem [resolvable:$true] %s442_s20 }
   0xe   :  { %v40_v2 = vld.sshfl [vmem:[#allocation1] sm:$0xff pattern:$0x73625140]  ;;  %v41_v3 = vld.sshfl [vmem:[#allocation1 + $0x8] sm:$0xff pattern:$0x73625140] }
   0xf   :  { %v42_v5 = vld.sshfl [vmem:[#allocation1 + $0x10] sm:$0xff pattern:$0x73625140]  ;;  %v43_v6 = vld.sshfl [vmem:[#allocation1 + $0x18] sm:$0xff pattern:$0x73625140] }
  0x10   :  { %v44_v8 = vld.sshfl [vmem:[#allocation1 + $0x20] sm:$0xff pattern:$0x73625140]  ;;  %v45_v9 = vld.sshfl [vmem:[#allocation1 + $0x28] sm:$0xff pattern:$0x73625140] }
  0x11   :  { %v46_v10 = vld.sshfl [vmem:[#allocation1 + $0x30] sm:$0xff pattern:$0x73625140]  ;;  %v47_v11 = vld.sshfl [vmem:[#allocation1 + $0x38] sm:$0xff pattern:$0x73625140] }
  0x12   :  { %v57_v12 = vsel %vm56_vm0, %v40_v2, 0.0  ;;  %v64_v13 = vsel %vm56_vm0, %v41_v3, 0.0  ;;  %v71_v14 = vsel %vm56_vm0, %v42_v5, 0.0  ;;  %v78_v15 = vsel %vm56_vm0, %v43_v6, 0.0  ;;  %125 = vst [vmem:[#allocation1] ss:$4 sm:$0xff] %v121_v4 }
  0x13   :  { %v58_v16 = vrot.slane %v57_v12, 4  ;;  %v65_v17 = vrot.slane %v64_v13, 4  ;;  %v72_v18 = vrot.slane %v71_v14, 4  ;;  %v79_v19 = vrot.slane %v78_v15, 4  ;;  %127 = vst [vmem:[#allocation1 + $0x20] ss:$4 sm:$0xff] %v122_v7 }
  0x14   :  { %v85_v20 = vsel %vm56_vm0, %v44_v8, 0.0  ;;  %v92_v21 = vsel %vm56_vm0, %v45_v9, 0.0  ;;  %v99_v22 = vsel %vm56_vm0, %v46_v10, 0.0  ;;  %v106_v23 = vsel %vm56_vm0, %v47_v11, 0.0 }
  0x15   :  { %v59_v24 = vadd.f32 %v58_v16, %v57_v12  ;;  %v66_v25 = vadd.f32 %v65_v17, %v64_v13  ;;  %v73_v26 = vadd.f32 %v72_v18, %v71_v14  ;;  %v80_v27 = vadd.f32 %v79_v19, %v78_v15 }
  0x16   :  { %v86_v28 = vrot.slane %v85_v20, 4  ;;  %v93_v29 = vrot.slane %v92_v21, 4  ;;  %v100_v30 = vrot.slane %v99_v22, 4  ;;  %v107_v31 = vrot.slane %v106_v23, 4 }
  0x17   :  { %v60_v32 = vrot.slane %v59_v24, 2  ;;  %v67_v33 = vrot.slane %v66_v25, 2  ;;  %v74_v34 = vrot.slane %v73_v26, 2  ;;  %v81_v35 = vrot.slane %v80_v27, 2 }
  0x18   :  { %v87_v36 = vadd.f32 %v86_v28, %v85_v20  ;;  %v94_v37 = vadd.f32 %v93_v29, %v92_v21  ;;  %v101_v38 = vadd.f32 %v100_v30, %v99_v22  ;;  %v108_v39 = vadd.f32 %v107_v31, %v106_v23 }
  0x19   :  { %v61_v40 = vadd.f32 %v60_v32, %v59_v24  ;;  %v68_v41 = vadd.f32 %v67_v33, %v66_v25  ;;  %v75_v42 = vadd.f32 %v74_v34, %v73_v26  ;;  %v82_v43 = vadd.f32 %v81_v35, %v80_v27  ;;  %v128_v56 = vld.sshfl [vmem:[#allocation1] sm:$0xff pattern:$0x73625140]  ;;  %v129_v57 = vld.sshfl [vmem:[#allocation1 + $0x8] sm:$0xff pattern:$0x73625140] }
  0x1a   :  { %v88_v44 = vrot.slane %v87_v36, 2  ;;  %v95_v45 = vrot.slane %v94_v37, 2  ;;  %v102_v46 = vrot.slane %v101_v38, 2  ;;  %v109_v47 = vrot.slane %v108_v39, 2 }
  0x1b   :  { %v62_v48 = vrot.slane %v61_v40, 1  ;;  %v69_v49 = vrot.slane %v68_v41, 1  ;;  %v76_v50 = vrot.slane %v75_v42, 1  ;;  %v83_v51 = vrot.slane %v82_v43, 1 }
  0x1c   :  { %v89_v52 = vadd.f32 %v88_v44, %v87_v36  ;;  %v96_v53 = vadd.f32 %v95_v45, %v94_v37  ;;  %v103_v54 = vadd.f32 %v102_v46, %v101_v38  ;;  %v110_v55 = vadd.f32 %v109_v47, %v108_v39  ;;  %v130_v62 = vld.sshfl [vmem:[#allocation1 + $0x10] sm:$0xff pattern:$0x73625140]  ;;  %v131_v63 = vld.sshfl [vmem:[#allocation1 + $0x18] sm:$0xff pattern:$0x73625140] }
  0x1d   :  { %v63_v58 = vadd.f32 %v62_v48, %v61_v40  ;;  %v70_v59 = vadd.f32 %v69_v49, %v68_v41  ;;  %v77_v60 = vadd.f32 %v76_v50, %v75_v42  ;;  %v84_v61 = vadd.f32 %v83_v51, %v82_v43  ;;  %v132_v8 = vld.sshfl [vmem:[#allocation1 + $0x20] sm:$0xff pattern:$0x73625140]  ;;  %v133_v9 = vld.sshfl [vmem:[#allocation1 + $0x28] sm:$0xff pattern:$0x73625140] }
  0x1e   :  { %v90_v0 = vrot.slane %v89_v52, 1  ;;  %v97_v1 = vrot.slane %v96_v53, 1  ;;  %v104_v2 = vrot.slane %v103_v54, 1  ;;  %v111_v3 = vrot.slane %v110_v55, 1 }
  0x1f   :  { %v599_v4 = vmul.f32 0.5, %v63_v58  ;;  %v601_v5 = vmul.f32 0.5, %v70_v59  ;;  %v603_v6 = vmul.f32 0.5, %v77_v60  ;;  %v605_v7 = vmul.f32 0.5, %v84_v61 }
  0x20   :  { %v91_v10 = vadd.f32 %v90_v0, %v89_v52  ;;  %v98_v11 = vadd.f32 %v97_v1, %v96_v53  ;;  %v105_v12 = vadd.f32 %v104_v2, %v103_v54  ;;  %v112_v13 = vadd.f32 %v111_v3, %v110_v55  ;;  %v134_v14 = vld.sshfl [vmem:[#allocation1 + $0x30] sm:$0xff pattern:$0x73625140]  ;;  %v135_v15 = vld.sshfl [vmem:[#allocation1 + $0x38] sm:$0xff pattern:$0x73625140] }
  0x21   :  { %v144_v16 = vsel %vm56_vm0, %v128_v56, 0.0  ;;  %v151_v17 = vsel %vm56_vm0, %v129_v57, 0.0  ;;  %v158_v18 = vsel %vm56_vm0, %v130_v62, 0.0  ;;  %v165_v19 = vsel %vm56_vm0, %v131_v63, 0.0 }
  0x22   :  { %v611_v20 = vmul.f32 0.5, %v91_v10  ;;  %v613_v21 = vmul.f32 0.5, %v98_v11  ;;  %v615_v22 = vmul.f32 0.5, %v105_v12  ;;  %v617_v23 = vmul.f32 0.5, %v112_v13 }
  0x23   :  { %v145_v24 = vrot.slane %v144_v16, 4  ;;  %v152_v25 = vrot.slane %v151_v17, 4  ;;  %v159_v26 = vrot.slane %v158_v18, 4  ;;  %v166_v27 = vrot.slane %v165_v19, 4 }
  0x24   :  { %v172_v28 = vsel %vm56_vm0, %v132_v8, 0.0  ;;  %v179_v29 = vsel %vm56_vm0, %v133_v9, 0.0  ;;  %v186_v30 = vsel %vm56_vm0, %v134_v14, 0.0  ;;  %v193_v31 = vsel %vm56_vm0, %v135_v15, 0.0 }
  0x25   :  { %v146_v32 = vadd.f32 %v145_v24, %v144_v16  ;;  %v153_v33 = vadd.f32 %v152_v25, %v151_v17  ;;  %v160_v34 = vadd.f32 %v159_v26, %v158_v18  ;;  %v167_v35 = vadd.f32 %v166_v27, %v165_v19 }
  0x26   :  { %v173_v36 = vrot.slane %v172_v28, 4  ;;  %v180_v37 = vrot.slane %v179_v29, 4  ;;  %v187_v38 = vrot.slane %v186_v30, 4  ;;  %v194_v39 = vrot.slane %v193_v31, 4 }
  0x27   :  { %v147_v40 = vrot.slane %v146_v32, 2  ;;  %v154_v41 = vrot.slane %v153_v33, 2  ;;  %v161_v42 = vrot.slane %v160_v34, 2  ;;  %v168_v43 = vrot.slane %v167_v35, 2 }
  0x28   :  { %v174_v44 = vadd.f32 %v173_v36, %v172_v28  ;;  %v181_v45 = vadd.f32 %v180_v37, %v179_v29  ;;  %v188_v46 = vadd.f32 %v187_v38, %v186_v30  ;;  %v195_v47 = vadd.f32 %v194_v39, %v193_v31 }
  0x29   :  { %v148_v48 = vadd.f32 %v147_v40, %v146_v32  ;;  %v155_v49 = vadd.f32 %v154_v41, %v153_v33  ;;  %v162_v50 = vadd.f32 %v161_v42, %v160_v34  ;;  %v169_v51 = vadd.f32 %v168_v43, %v167_v35 }
  0x2a   :  { %v175_v52 = vrot.slane %v174_v44, 2  ;;  %v182_v53 = vrot.slane %v181_v45, 2  ;;  %v189_v54 = vrot.slane %v188_v46, 2  ;;  %v196_v55 = vrot.slane %v195_v47, 2 }
  0x2b   :  { %v149_v56 = vrot.slane %v148_v48, 1  ;;  %v156_v57 = vrot.slane %v155_v49, 1  ;;  %v163_v58 = vrot.slane %v162_v50, 1  ;;  %v170_v59 = vrot.slane %v169_v51, 1 }
  0x2c   :  { %v176_v60 = vadd.f32 %v175_v52, %v174_v44  ;;  %v183_v61 = vadd.f32 %v182_v53, %v181_v45  ;;  %v190_v62 = vadd.f32 %v189_v54, %v188_v46  ;;  %v197_v63 = vadd.f32 %v196_v55, %v195_v47 }
  0x2d   :  { %v150_v0 = vadd.f32 %v149_v56, %v148_v48  ;;  %v157_v1 = vadd.f32 %v156_v57, %v155_v49  ;;  %v164_v2 = vadd.f32 %v163_v58, %v162_v50  ;;  %v171_v3 = vadd.f32 %v170_v59, %v169_v51 }
  0x2e   :  { %v177_v8 = vrot.slane %v176_v60, 1  ;;  %v184_v9 = vrot.slane %v183_v61, 1  ;;  %v191_v10 = vrot.slane %v190_v62, 1  ;;  %v198_v11 = vrot.slane %v197_v63, 1 }
  0x2f   :  { %v200_v12 = vmul.f32 0.5, %v150_v0  ;;  %v201_v13 = vmul.f32 0.5, %v157_v1  ;;  %v202_v14 = vmul.f32 0.5, %v164_v2  ;;  %v203_v15 = vmul.f32 0.5, %v171_v3 }
  0x30   :  { %v178_v16 = vadd.f32 %v177_v8, %v176_v60  ;;  %v185_v17 = vadd.f32 %v184_v9, %v183_v61  ;;  %v192_v18 = vadd.f32 %v191_v10, %v190_v62  ;;  %v199_v19 = vadd.f32 %v198_v11, %v197_v63 }
  0x31   :  { %v208_v24 = vmul.f32 %v599_v4, %v599_v4  ;;  %v209_v25 = vmul.f32 %v601_v5, %v601_v5  ;;  %v210_v26 = vmul.f32 %v603_v6, %v603_v6  ;;  %v211_v27 = vmul.f32 %v605_v7, %v605_v7 }
  0x32   :  { %v204_v28 = vmul.f32 0.5, %v178_v16  ;;  %v205_v29 = vmul.f32 0.5, %v185_v17  ;;  %v206_v30 = vmul.f32 0.5, %v192_v18  ;;  %v207_v31 = vmul.f32 0.5, %v199_v19 }
  0x33   :  { %v212_v32 = vmul.f32 %v611_v20, %v611_v20  ;;  %v213_v33 = vmul.f32 %v613_v21, %v613_v21  ;;  %v214_v4 = vmul.f32 %v615_v22, %v615_v22  ;;  %v215_v5 = vmul.f32 %v617_v23, %v617_v23 }
  0x34   :  { %v216_v6 = vsub.f32 %v200_v12, %v208_v24  ;;  %v217_v34 = vsub.f32 %v201_v13, %v209_v25  ;;  %v218_v35 = vsub.f32 %v202_v14, %v210_v26  ;;  %v219_v7 = vsub.f32 %v203_v15, %v211_v27 }
  0x35   :  { %v220_v36 = vsub.f32 %v204_v28, %v212_v32  ;;  %v221_v37 = vsub.f32 %v205_v29, %v213_v33  ;;  %v222_v38 = vsub.f32 %v206_v30, %v214_v4  ;;  %v223_v20 = vsub.f32 %v207_v31, %v215_v5 }
  0x36   :  { %vm224_vm1 = vcmp.lt.f32.partialorder %v216_v6, 1e-08  ;;  %vm225_vm2 = vcmp.lt.f32.partialorder %v217_v34, 1e-08  ;;  %vm226_vm3 = vcmp.lt.f32.partialorder %v218_v35, 1e-08 }
  0x37   :  { %vm227_vm4 = vcmp.lt.f32.partialorder %v219_v7, 1e-08  ;;  %vm228_vm5 = vcmp.lt.f32.partialorder %v220_v36, 1e-08  ;;  %v639_v21 = vsel %vm224_vm1, 1e-08, %v216_v6 }
  0x38   :  { %vm229_vm6 = vcmp.lt.f32.partialorder %v221_v37, 1e-08  ;;  %v641_v22 = vsel %vm225_vm2, 1e-08, %v217_v34  ;;  %v643_v39 = vsel %vm226_vm3, 1e-08, %v218_v35  ;;  %475 = vrsqrt.f32 %v639_v21 }
  0x39   :  { %v646_v23 = vsel %vm227_vm4, 1e-08, %v219_v7  ;;  %477 = vrsqrt.f32 %v641_v22  ;;  %vm230_vm7 = vcmp.lt.f32.partialorder %v222_v38, 1e-08  ;;  %v649_v40 = vsel %vm228_vm5, 1e-08, %v220_v36 }
  0x3a   :  { %vm231_vm8 = vcmp.lt.f32.partialorder %v223_v20, 1e-08  ;;  %v651_v41 = vsel %vm229_vm6, 1e-08, %v221_v37  ;;  %479 = vrsqrt.f32 %v643_v39  ;;  %v655_v42 = vsel %vm230_vm7, 1e-08, %v222_v38 }
  0x3b   :  { %481 = vrsqrt.f32 %v646_v23  ;;  %v658_v44 = vsel %vm231_vm8, 1e-08, %v223_v20  ;;  %vm247_vm9 = vcmp.eq.f32.partialorder %v639_v21, inf  ;;  %vm249_vm10 = vcmp.eq.f32.partialorder %v639_v21, 0.0 }
  0x3c   :  { %483 = vrsqrt.f32 %v649_v40  ;;  %v250_v50 = vand.u32 2147483648, %v639_v21  ;;  %vm259_vm11 = vcmp.eq.f32.partialorder %v641_v22, inf  ;;  %vm261_vm12 = vcmp.eq.f32.partialorder %v641_v22, 0.0 }
  0x3d   :  { %485 = vrsqrt.f32 %v651_v41  ;;  %v262_v53 = vand.u32 2147483648, %v641_v22  ;;  %vm271_vm13 = vcmp.eq.f32.partialorder %v643_v39, inf  ;;  %v274_v57 = vand.u32 2147483648, %v643_v39 }
  0x3e   :  { %v476_v43 = vpop.eup %475  ;;  %487 = vrsqrt.f32 %v655_v42  ;;  %v286_v59 = vand.u32 2147483648, %v646_v23  ;;  %vm273_vm14 = vcmp.eq.f32.partialorder %v643_v39, 0.0  ;;  %vm283_vm15 = vcmp.eq.f32.partialorder %v646_v23, inf }
  0x3f   :  { %v478_v45 = vpop.eup %477  ;;  %v241_v46 = vmul.f32 %v476_v43, %v639_v21  ;;  %489 = vrsqrt.f32 %v658_v44  ;;  %v298_v0 = vand.u32 2147483648, %v649_v40  ;;  %vm285_vm0 = vcmp.eq.f32.partialorder %v646_v23, 0.0 }
  0x40   :  { %v253_v47 = vmul.f32 %v478_v45, %v641_v22  ;;  %v480_v48 = vpop.eup %479  ;;  %vm295_vm1 = vcmp.eq.f32.partialorder %v649_v40, inf  ;;  %v310_v8 = vand.u32 2147483648, %v651_v41  ;;  %vm297_vm2 = vcmp.eq.f32.partialorder %v649_v40, 0.0 }
  0x41   :  { %v242_v49 = vmul.f32 %v476_v43, %v241_v46  ;;  %v482_v51 = vpop.eup %481  ;;  %v265_v54 = vmul.f32 %v480_v48, %v643_v39  ;;  %vm307_vm3 = vcmp.eq.f32.partialorder %v651_v41, inf  ;;  %v322_v13 = vand.u32 2147483648, %v655_v42 }
  0x42   :  { %v254_v52 = vmul.f32 %v478_v45, %v253_v47  ;;  %v484_v55 = vpop.eup %483  ;;  %v277_v58 = vmul.f32 %v482_v51, %v646_v23  ;;  %vm309_vm4 = vcmp.eq.f32.partialorder %v651_v41, 0.0  ;;  %vm319_vm5 = vcmp.eq.f32.partialorder %v655_v42, inf }
  0x43   :  { %v243_v56 = vmul.f32 0.5, %v242_v49  ;;  %v486_v60 = vpop.eup %485  ;;  %v266_v62 = vmul.f32 %v480_v48, %v265_v54  ;;  %v289_v63 = vmul.f32 %v484_v55, %v649_v40  ;;  %vm321_vm6 = vcmp.eq.f32.partialorder %v655_v42, 0.0 }
  0x44   :  { %v255_v61 = vmul.f32 0.5, %v254_v52  ;;  %v278_v2 = vmul.f32 %v482_v51, %v277_v58  ;;  %v301_v3 = vmul.f32 %v486_v60, %v651_v41  ;;  %v488_v9 = vpop.eup %487  ;;  %vm331_vm7 = vcmp.eq.f32.partialorder %v658_v44, inf }
  0x45   :  { %v244_v1 = vsub.f32 1.5, %v243_v56  ;;  %v267_v11 = vmul.f32 0.5, %v266_v62  ;;  %v290_v12 = vmul.f32 %v484_v55, %v289_v63  ;;  %v490_v14 = vpop.eup %489  ;;  %v313_v18 = vmul.f32 %v488_v9, %v655_v42 }
  0x46   :  { %v256_v10 = vsub.f32 1.5, %v255_v61  ;;  %v279_v16 = vmul.f32 0.5, %v278_v2  ;;  %v302_v17 = vmul.f32 %v486_v60, %v301_v3  ;;  %v325_v26 = vmul.f32 %v490_v14, %v658_v44 }
  0x47   :  { %v245_v15 = vmul.f32 %v476_v43, %v244_v1  ;;  %v268_v24 = vsub.f32 1.5, %v267_v11  ;;  %v291_v25 = vmul.f32 0.5, %v290_v12  ;;  %v314_v30 = vmul.f32 %v488_v9, %v313_v18 }
  0x48   :  { %v257_v19 = vmul.f32 %v478_v45, %v256_v10  ;;  %v280_v28 = vsub.f32 1.5, %v279_v16  ;;  %v303_v29 = vmul.f32 0.5, %v302_v17  ;;  %v326_v4 = vmul.f32 %v490_v14, %v325_v26 }
  0x49   :  { %v246_v27 = vmul.f32 %v245_v15, %v639_v21  ;;  %v269_v32 = vmul.f32 %v480_v48, %v268_v24  ;;  %v292_v33 = vsub.f32 1.5, %v291_v25  ;;  %v315_v35 = vmul.f32 0.5, %v314_v30 }
  0x4a   :  { %v258_v31 = vmul.f32 %v257_v19, %v641_v22  ;;  %v281_v6 = vmul.f32 %v482_v51, %v280_v28  ;;  %v304_v34 = vsub.f32 1.5, %v303_v29  ;;  %v327_v48 = vmul.f32 0.5, %v326_v4 }
  0x4b   :  { %v248_v5 = vsel %vm247_vm9, %v639_v21, %v246_v27  ;;  %v270_v37 = vmul.f32 %v269_v32, %v643_v39  ;;  %v293_v38 = vmul.f32 %v484_v55, %v292_v33  ;;  %v316_v46 = vsub.f32 1.5, %v315_v35 }
  0x4c   :  { %v251_v7 = vsel %vm249_vm10, %v250_v50, %v248_v5  ;;  %v260_v36 = vsel %vm259_vm11, %v641_v22, %v258_v31  ;;  %v282_v43 = vmul.f32 %v281_v6, %v646_v23  ;;  %v305_v45 = vmul.f32 %v486_v60, %v304_v34 }
  0x4d   :  { %v263_v20 = vsel %vm261_vm12, %v262_v53, %v260_v36  ;;  %v272_v47 = vsel %vm271_vm13, %v643_v39, %v270_v37  ;;  %v294_v21 = vmul.f32 %v293_v38, %v649_v40  ;;  %vm336_vm8 = vcmp.ge.f32.partialorder %v251_v7, 0.0002 }
  0x4e   :  { %v275_v49 = vsel %vm273_vm14, %v274_v57, %v272_v47  ;;  %v284_v22 = vsel %vm283_vm15, %v646_v23, %v282_v43  ;;  %v306_v50 = vmul.f32 %v305_v45, %v651_v41  ;;  %v317_v51 = vmul.f32 %v488_v9, %v316_v46 }
  0x4f   :  { %v287_v52 = vsel %vm285_vm0, %v286_v59, %v284_v22  ;;  %v296_v53 = vsel %vm295_vm1, %v649_v40, %v294_v21  ;;  %v328_v54 = vsub.f32 1.5, %v327_v48  ;;  %vm337_vm9 = vcmp.ge.f32.partialorder %v263_v20, 0.0002 }
  0x50   :  { %v299_v39 = vsel %vm297_vm2, %v298_v0, %v296_v53  ;;  %v308_v55 = vsel %vm307_vm3, %v651_v41, %v306_v50  ;;  %v318_v56 = vmul.f32 %v317_v51, %v655_v42  ;;  %vm338_vm10 = vcmp.ge.f32.partialorder %v275_v49, 0.0002 }
  0x51   :  { %v329_v57 = vmul.f32 %v490_v14, %v328_v54  ;;  %v334_v23 = vand.u32 2147483648, %v658_v44  ;;  %vm339_vm11 = vcmp.ge.f32.partialorder %v287_v52, 0.0002  ;;  %vm353_vm12 = vcmask 1040384  }
  0x52   :  { %v311_v58 = vsel %vm309_vm4, %v310_v8, %v308_v55  ;;  %v320_v40 = vsel %vm319_vm5, %v655_v42, %v318_v56  ;;  %v345_v59 = vsel %vm336_vm8, %v251_v7, 0.0  ;;  %v346_v60 = vsel %vm337_vm9, %v263_v20, 0.0 }
  0x53   :  { %v330_v61 = vmul.f32 %v329_v57, %v658_v44  ;;  %vm333_vm13 = vcmp.eq.f32.partialorder %v658_v44, 0.0  ;;  %vm340_vm14 = vcmp.ge.f32.partialorder %v299_v39, 0.0002  ;;  %v347_v62 = vsel %vm338_vm10, %v275_v49, 0.0 }
  0x54   :  { %v323_v41 = vsel %vm321_vm6, %v322_v13, %v320_v40  ;;  %v348_v63 = vsel %vm339_vm11, %v287_v52, 0.0  ;;  %v354_v0 = vsel %vm353_vm12, %v345_v59, 0.0  ;;  %vm341_vm15 = vcmp.ge.f32.partialorder %v311_v58, 0.0002 }
  0x55   :  { %v332_v1 = vsel %vm331_vm7, %v658_v44, %v330_v61  ;;  %v355_v2 = vsel %vm353_vm12, %v346_v60, 0.0  ;;  %v357_v3 = vsel %vm353_vm12, %v347_v62, 0.0  ;;  %v349_v9 = vsel %vm340_vm14, %v299_v39, 0.0 }
  0x56   :  { %v335_v8 = vsel %vm333_vm13, %v334_v23, %v332_v1  ;;  %v356_v10 = vadd.f32 %v355_v2, %v354_v0  ;;  %vm342_vm0 = vcmp.ge.f32.partialorder %v323_v41, 0.0002  ;;  %v359_v42 = vsel %vm353_vm12, %v348_v63, 0.0 }
  0x57   :  { %v570_v11 = vmov 0.0   ;;  %v350_v13 = vsel %vm341_vm15, %v311_v58, 0.0  ;;  %vm343_vm1 = vcmp.ge.f32.partialorder %v335_v8, 0.0002  ;;  %v361_v16 = vsel %vm353_vm12, %v349_v9, 0.0 }
  0x58   :  { %v459_v12 = vsel %vm336_vm8, 1.0, %v570_v11  ;;  %v358_v14 = vadd.f32 %v357_v3, %v356_v10  ;;  %v460_v44 = vsel %vm337_vm9, 1.0, %v570_v11  ;;  %v461_v15 = vsel %vm338_vm10, 1.0, %v570_v11 }
  0x59   :  { %v351_v17 = vsel %vm342_vm0, %v323_v41, 0.0  ;;  %v462_v19 = vsel %vm339_vm11, 1.0, %v570_v11  ;;  %v399_v24 = vsel %vm353_vm12, %v459_v12, 0.0  ;;  %v363_v25 = vsel %vm353_vm12, %v350_v13, 0.0 }
  0x5a   :  { %v360_v18 = vadd.f32 %v359_v42, %v358_v14  ;;  %v400_v26 = vsel %vm353_vm12, %v460_v44, 0.0  ;;  %v402_v27 = vsel %vm353_vm12, %v461_v15, 0.0  ;;  %v352_v28 = vsel %vm343_vm1, %v335_v8, 0.0 }
  0x5b   :  { %v463_v30 = vsel %vm340_vm14, 1.0, %v570_v11  ;;  %v401_v31 = vadd.f32 %v400_v26, %v399_v24  ;;  %v365_v32 = vsel %vm353_vm12, %v351_v17, 0.0  ;;  %v404_v33 = vsel %vm353_vm12, %v462_v19, 0.0 }
  0x5c   :  { %v362_v29 = vadd.f32 %v361_v16, %v360_v18  ;;  %v464_v5 = vsel %vm341_vm15, 1.0, %v570_v11  ;;  %v367_v34 = vsel %vm353_vm12, %v352_v28, 0.0  ;;  %v406_v35 = vsel %vm353_vm12, %v463_v30, 0.0 }
  0x5d   :  { %v403_v6 = vadd.f32 %v402_v27, %v401_v31  ;;  %v465_v36 = vsel %vm342_vm0, 1.0, %v570_v11  ;;  %v408_v38 = vsel %vm353_vm12, %v464_v5, 0.0  ;;  %v466_v43 = vsel %vm343_vm1, 1.0, %v570_v11 }
  0x5e   :  { %v364_v4 = vadd.f32 %v363_v25, %v362_v29  ;;  %v410_v46 = vsel %vm353_vm12, %v465_v36, 0.0  ;;  %v412_v21 = vsel %vm353_vm12, %v466_v43, 0.0  ;;  %vm30_vm2 = vcmask 0  }
  0x5f   :  { %v405_v37 = vadd.f32 %v404_v33, %v403_v6  ;;  %31 = vst.msk [vmem:[#allocation5] sm:$0x1] %vm30_vm2, %v570_v11 }
  0x60   :  { %v366_v7 = vadd.f32 %v365_v32, %v364_v4  ;;  %32 = vst.msk [vmem:[#allocation6] sm:$0x1] %vm30_vm2, %v570_v11 }
  0x61   :  { %v407_v45 = vadd.f32 %v406_v35, %v405_v37 }
  0x62   :  { %v368_v20 = vadd.f32 %v367_v34, %v366_v7 }
  0x63   :  { %v409_v47 = vadd.f32 %v408_v38, %v407_v45 }
  0x64   :  { %369 = vadd.xlane.f32.xlu0 %v368_v20 }
  0x65   :  { %v411_v48 = vadd.f32 %v410_v46, %v409_v47 }
  0x66   :  { %v344_v60 = vld [vmem:[#allocation5] sm:$0x1] }
  0x67   :  { %v413_v49 = vadd.f32 %v412_v21, %v411_v48  ;;  %v382_v41 = vld [vmem:[#allocation6] sm:$0x1] }
  0x6c   :  { %414 = vadd.xlane.f32.xlu0 %v413_v49 }
  0xd7   :  { %v370_v22 = vpop.xlane.xlu0 %369 }
  0xd8   :  { %v371_v50 = vrot.slane %v370_v22, 4 }
  0xda   :  { %v372_v51 = vadd.f32 %v371_v50, %v370_v22 }
  0xdc   :  { %v373_v52 = vrot.slane %v372_v51, 2 }
  0xde   :  { %v374_v53 = vadd.f32 %v373_v52, %v372_v51 }
  0xdf   :  { %v415_v54 = vpop.xlane.xlu0 %414 }
  0xe0   :  { %v416_v39 = vrot.slane %v415_v54, 4  ;;  %v375_v55 = vrot.slane %v374_v53, 1 }
  0xe2   :  { %v417_v56 = vadd.f32 %v416_v39, %v415_v54  ;;  %v376_v57 = vadd.f32 %v375_v55, %v374_v53 }
  0xe4   :  { %v418_v23 = vrot.slane %v417_v56, 2  ;;  %467 = vpush %v376_v57 }
  0xe6   :  { %v419_v58 = vadd.f32 %v418_v23, %v417_v56 }
  0xe8   :  { %v420_v40 = vrot.slane %v419_v58, 1 }
  0xea   :  { %v421_v59 = vadd.f32 %v420_v40, %v419_v58 }
  0xec   :  { %469 = vpush %v421_v59 }
 0x115   :  { %s468_s18 = spop %467 }
 0x116   :  { %v378_v61 = vstv %s468_s18 }
 0x117   :  { %v379_v62 = vadd.f32 %v378_v61, %v344_v60 }
 0x119   :  { %381 = vst.msk [vmem:[#allocation5] sm:$0x1] %vm30_vm2, %v379_v62 }
 0x11a   :  { %436 = dma.vmem_to_hbm [thread:$0]  %s432_s14, 16, %s434_s17, [#allocation4]  }
 0x11d   :  { %s470_s24 = spop %469 }
 0x11e   :  { %v423_v63 = vstv %s470_s24 }
 0x11f   :  { %v424_v0 = vadd.f32 %v423_v63, %v382_v41 }
 0x121   :  { %425 = vst.msk [vmem:[#allocation6] sm:$0x1] %vm30_vm2, %v424_v0 }
 0x122   :  { %447 = dma.vmem_to_hbm [thread:$0]  %s443_s20, 16, %s445_s23, [#allocation7]  }
 0x123   :  { %565 = dma.done.wait [#allocation4], 16  }
 0x124   :  { %566 = vsyncadd [#allocation4], 4294967280 }
 0x125   :  { %567 = dma.done.wait [#allocation7], 16  }
 0x126   :  { %568 = vsyncadd [#allocation7], 4294967280 }
 0x127   :  { %456 = vsyncpa [#allocation3], 1 }
 0x128   :  { %457 = vsyncpa [#allocation4], 1 }
 0x129   :  { %458 = vsyncpa [#allocation7], 1 }

</bundles_post_ra>
